<compile_context>
chip_gen: v6e
topology: v6e:2x2x1
jax: 0.10.0
libtpu: 0.0.40
codegen_flags: <defaults>
</compile_context>

<pallas_src>
import functools

import jax
import jax.numpy as jnp
import numpy as np
from jax.experimental import pallas as pl
from jax.experimental.pallas import tpu as pltpu


def _round_up(x, m):
    return ((x + m - 1) // m) * m


def _grandag_kernel(x_ref, wbig_ref, b1_ref, w2bd_ref, b2_ref, out_ref):
    """Single fused step per batch tile.

    Block shapes:
      x_ref    : (TB, V)       bf16 inputs (batch tile)
      wbig_ref : (V, VHp)      bf16, adjacency-scaled first-layer weights of ALL nets
      b1_ref   : (1, VHp)      f32
      w2bd_ref : (VHp, Vp)     bf16, block-diagonal second-layer weights (lane-padded)
      b2_ref   : (1, Vp)       f32 (lane-padded with zeros)
      out_ref  : (TB, Vp)      f32, one full lane-dense store per step
    """
    # First layer: one lane-dense MXU matmul covering all V networks.
    h = jnp.dot(x_ref[...], wbig_ref[...], preferred_element_type=jnp.float32)  # (TB, VHp)
    h = jnp.maximum(h + b1_ref[...], 0.0)                                        # bias + ReLU (f32)

    # Second layer: block-diagonal contraction, bf16 operands, f32 accumulation.
    out = jnp.dot(h.astype(jnp.bfloat16), w2bd_ref[...],
                  preferred_element_type=jnp.float32) + b2_ref[...]              # (TB, Vp)
    out_ref[...] = out.astype(out_ref.dtype)                                     # single unmasked store


@functools.partial(jax.jit, static_argnames=("batch_tile",))
def grandag_forward(x_bf16, w_big, b1_flat, w2_bd, b2_flat, *, batch_tile=None):
    """Runs the fused kernel and slices the lane padding off the output."""
    B, V = x_bf16.shape
    VHp = w_big.shape[1]
    Vp = w2_bd.shape[1]

    # Batch tile: largest reasonable tile (per-step overhead ~0.35us amortizes
    # above ~512 rows); keep sublane alignment when tiling. On v7x pass
    # batch_tile <= B // 2 so the grid has >= 2 "parallel" steps for both TCs.
    tb = min(B, 512) if batch_tile is None else batch_tile
    if tb != B:
        tb = max(16, (tb // 16) * 16)

    # Constant-index operands: resident for the whole launch, single-buffered.
    def _resident(shape):
        return pl.BlockSpec(shape, lambda b: (0, 0),
                            pipeline_mode=pl.Buffered(buffer_count=1))

    flops = 2 * B * V * VHp + 2 * B * VHp * Vp
    bytes_accessed = (x_bf16.size * 2 + w_big.size * 2 + b1_flat.size * 4
                      + w2_bd.size * 2 + b2_flat.size * 4 + B * Vp * 4)

    out_padded = pl.pallas_call(
        _grandag_kernel,
        out_shape=jax.ShapeDtypeStruct((B, Vp), jnp.float32),
        grid=(pl.cdiv(B, tb),),
        in_specs=[
            pl.BlockSpec((tb, V), lambda b: (b, 0)),   # x (batch tile, double-buffered)
            _resident((V, VHp)),                       # W_big (all nets)
            _resident((1, VHp)),                       # b1 (all nets)
            _resident((VHp, Vp)),                      # W2 block-diagonal (bf16, padded)
            _resident((1, Vp)),                        # b2 (padded)
        ],
        out_specs=pl.BlockSpec((tb, Vp), lambda b: (b, 0)),
        compiler_params=pltpu.CompilerParams(
            dimension_semantics=("parallel",),         # batch axis is embarrassingly parallel
            vmem_limit_bytes=64 * 1024 * 1024,         # raise v5e's 16 MiB scoped default
        ),
        cost_estimate=pl.CostEstimate(flops=flops, transcendentals=0,
                                      bytes_accessed=bytes_accessed),
    )(x_bf16, w_big, b1_flat, w2_bd, b2_flat)

    return out_padded[:, :V]                           # drop lane padding outside the kernel


def build_params(key, num_vars, hidden_dim):
    """Deterministic synthetic parameters matching GraNDAG.__init__ shapes."""
    V, H = num_vars, hidden_dim
    in_dim = V - 1
    ks = jax.random.split(key, 5)

    # adj_weights ~ randn(V, V) * 0.1
    adj_weights = jax.random.normal(ks[0], (V, V), jnp.float32) * 0.1

    # per-variable MLP params (PyTorch-Linear-style uniform init)
    lim1 = 1.0 / np.sqrt(in_dim)
    lim2 = 1.0 / np.sqrt(H)
    W1 = jax.random.uniform(ks[1], (V, H, in_dim), jnp.float32, -lim1, lim1)
    b1 = jax.random.uniform(ks[2], (V, H), jnp.float32, -lim1, lim1)
    W2 = jax.random.uniform(ks[3], (V, 1, H), jnp.float32, -lim2, lim2)
    b2 = jax.random.uniform(ks[4], (V, 1), jnp.float32, -lim2, lim2)
    return adj_weights, W1, b1, W2, b2


def prepare_kernel_inputs(adj_weights, W1, b1, W2, b2):
    """Plain-JAX glue (one-time): fold mask + adjacency into the weights, pad, cast."""
    V, H, _ = W1.shape
    VH = V * H

    # adjacency with zeroed diagonal
    adj = jax.nn.sigmoid(adj_weights) * (1.0 - jnp.eye(V, dtype=jnp.float32))     # (V, V)

    # Vectorized expansion of W1[i] (H, V-1) -> (V, H) with a zero row at i.
    i = jnp.arange(V)[:, None]                                                    # (V, 1) net index
    j = jnp.arange(V)[None, :]                                                    # (1, V) input column
    src = jnp.where(j == i, 0, j - (j > i).astype(jnp.int32))                     # (V, V), in [0, V-2]
    W1_t = jnp.transpose(W1, (0, 2, 1))                                           # (V, V-1, H)
    idx = jnp.broadcast_to(src[:, :, None], (V, V, H))
    W1_full = jnp.take_along_axis(W1_t, idx, axis=1)                              # (V, V, H)
    W1_full = jnp.where((j == i)[:, :, None], 0.0, W1_full)                       # zero row i

    # Fold the adjacency row into the first-layer weights (masking included,
    # since adj[i, i] == 0).
    W1_scaled = adj[:, :, None] * W1_full                                         # (V_net, V_in, H)

    # Concatenate all nets along the hidden axis -> lane-dense (V_in, V*H).
    W_big = jnp.transpose(W1_scaled, (1, 0, 2)).reshape(V, VH)
    b1_flat = b1.reshape(1, VH)

    # Block-diagonal second layer: (V*H, V) with W2[i] occupying block (i, i).
    W2s = W2.reshape(V, H)
    W2_bd = (W2s[:, :, None] * jnp.eye(V, dtype=jnp.float32)[:, None, :]).reshape(VH, V)
    b2_flat = b2.reshape(1, V)

    # --- padding (all exact) ---
    # Hidden axis VH -> VHp (multiple of 256): padded columns of W_big / b1 are
    # zero so relu(0+0)=0, and the matching W2_bd rows are zero.
    VHp = _round_up(VH, 256)
    # Output/net axis V -> Vp (multiple of 128): lane-dense output stores and a
    # proper MXU N dim; padded columns of W2_bd / b2 are zero and sliced off.
    Vp = _round_up(max(V, 128), 128)

    W_big = jnp.pad(W_big, ((0, 0), (0, VHp - VH)))
    b1_flat = jnp.pad(b1_flat, ((0, 0), (0, VHp - VH)))
    W2_bd = jnp.pad(W2_bd, ((0, VHp - VH), (0, Vp - V)))
    b2_flat = jnp.pad(b2_flat, ((0, 0), (0, Vp - V)))

    # bf16 for both large matmul operands (halves DMA bytes, MXU-native on all
    # generations incl. v5e); accumulation stays f32 inside the kernel; the
    # structural zeros remain exact in bf16.
    return (W_big.astype(jnp.bfloat16), b1_flat,
            W2_bd.astype(jnp.bfloat16), b2_flat)


def reference_forward(x, adj_weights, W1, b1, W2, b2):
    """Pure-JAX f32 replica of the PyTorch forward (for verification)."""
    V = adj_weights.shape[0]
    adj = jax.nn.sigmoid(adj_weights) * (1.0 - jnp.eye(V, dtype=jnp.float32))
    outs = []
    for i in range(V):
        mask = np.ones(V, dtype=bool)
        mask[i] = False
        inp = x[:, mask] * adj[i, mask][None, :]                 # (B, V-1)
        h = jnp.maximum(inp @ W1[i].T + b1[i][None, :], 0.0)     # (B, H)
        o = h @ W2[i].T + b2[i][None, :]                         # (B, 1)
        outs.append(o)
    return jnp.concatenate(outs, axis=1)                         # (B, V)


if __name__ == "__main__":
    num_vars = 8
    hidden_dim = 32
    batch = 8

    key = jax.random.PRNGKey(0)
    kx, kp = jax.random.split(key)
    x = jax.random.normal(kx, (batch, num_vars), jnp.float32)

    adj_weights, W1, b1, W2, b2 = build_params(kp, num_vars, hidden_dim)
    w_big, b1_flat, w2_bd, b2_flat = prepare_kernel_inputs(adj_weights, W1, b1, W2, b2)

    out = grandag_forward(x.astype(jnp.bfloat16), w_big, b1_flat, w2_bd, b2_flat)
    out = jax.block_until_ready(out)

    ref = reference_forward(x, adj_weights, W1, b1, W2, b2)
    # bf16 inputs/weights/h with f32 accumulation: ~1e-2 relative precision.
    np.testing.assert_allclose(np.asarray(out), np.asarray(ref), rtol=4e-2, atol=4e-2)

    print("KERNEL_OK")
</pallas_src>

<mosaic_0001>
module attributes {stable_mosaic.version = 11 : i64} {
  func.func @_grandag_kernel(%arg0: i32, %arg1: memref<8x8xbf16, #tpu.memory_space<vmem>>, %arg2: memref<8x256xbf16, #tpu.memory_space<vmem>>, %arg3: memref<1x256xf32, #tpu.memory_space<vmem>>, %arg4: memref<256x128xbf16, #tpu.memory_space<vmem>>, %arg5: memref<1x128xf32, #tpu.memory_space<vmem>>, %arg6: memref<8x128xf32, #tpu.memory_space<vmem>>) attributes {dimension_semantics = [#tpu.dimension_semantics<parallel>], iteration_bounds = array<i64: 1>, scalar_prefetch = 0 : i64, scratch_operands = 0 : i64, tpu.core_type = #tpu.core_type<tc>, window_params = [{transform_indices = @transform_0, window_bounds = array<i64: 8, 8>}, {pipeline_mode = #tpu.pipeline_mode<synchronous>, transform_indices = @transform_1, window_bounds = array<i64: 8, 256>}, {pipeline_mode = #tpu.pipeline_mode<synchronous>, transform_indices = @transform_2, window_bounds = array<i64: 1, 256>}, {pipeline_mode = #tpu.pipeline_mode<synchronous>, transform_indices = @transform_3, window_bounds = array<i64: 256, 128>}, {pipeline_mode = #tpu.pipeline_mode<synchronous>, transform_indices = @transform_4, window_bounds = array<i64: 1, 128>}, {transform_indices = @transform_5, window_bounds = array<i64: 8, 128>}]} {
    %c0 = arith.constant 0 : index
    %c0_0 = arith.constant 0 : index
    %0 = vector.load %arg1[%c0, %c0_0] : memref<8x8xbf16, #tpu.memory_space<vmem>>, vector<8x8xbf16>
    %c0_1 = arith.constant 0 : index
    %c0_2 = arith.constant 0 : index
    %1 = vector.load %arg2[%c0_1, %c0_2] : memref<8x256xbf16, #tpu.memory_space<vmem>>, vector<8x256xbf16>
    %cst = arith.constant dense<0.000000e+00> : vector<8x256xf32>
    %2 = tpu.matmul %0, %1, %cst {dimension_numbers = #tpu.dot_dimension_numbers<[1], [0], [0], [1], [0, 0, 1, 1], [], []>} : vector<8x8xbf16>, vector<8x256xbf16>, vector<8x256xf32> -> vector<8x256xf32>
    %c0_3 = arith.constant 0 : index
    %c0_4 = arith.constant 0 : index
    %3 = vector.load %arg3[%c0_3, %c0_4] : memref<1x256xf32, #tpu.memory_space<vmem>>, vector<1x256xf32>
    %4 = vector.broadcast %3 : vector<1x256xf32> to vector<8x256xf32>
    %5 = arith.addf %2, %4 : vector<8x256xf32>
    %cst_5 = arith.constant 0.000000e+00 : f32
    %6 = vector.broadcast %cst_5 : f32 to vector<8x256xf32>
    %7 = arith.maximumf %5, %6 : vector<8x256xf32>
    %8 = arith.truncf %7 : vector<8x256xf32> to vector<8x256xbf16>
    %c0_6 = arith.constant 0 : index
    %c0_7 = arith.constant 0 : index
    %9 = vector.load %arg4[%c0_6, %c0_7] : memref<256x128xbf16, #tpu.memory_space<vmem>>, vector<256x128xbf16>
    %cst_8 = arith.constant dense<0.000000e+00> : vector<8x128xf32>
    %10 = tpu.matmul %8, %9, %cst_8 {dimension_numbers = #tpu.dot_dimension_numbers<[1], [0], [0], [1], [0, 0, 1, 1], [], []>} : vector<8x256xbf16>, vector<256x128xbf16>, vector<8x128xf32> -> vector<8x128xf32>
    %c0_9 = arith.constant 0 : index
    %c0_10 = arith.constant 0 : index
    %11 = vector.load %arg5[%c0_9, %c0_10] : memref<1x128xf32, #tpu.memory_space<vmem>>, vector<1x128xf32>
    %12 = vector.broadcast %11 : vector<1x128xf32> to vector<8x128xf32>
    %13 = arith.addf %10, %12 : vector<8x128xf32>
    %c0_11 = arith.constant 0 : index
    %c0_12 = arith.constant 0 : index
    %14 = vector.load %arg6[%c0_11, %c0_12] : memref<8x128xf32, #tpu.memory_space<vmem>>, vector<8x128xf32>
    tpu.vector_store %arg6[%c0_11, %c0_12], %13 {strides = array<i32>} : memref<8x128xf32, #tpu.memory_space<vmem>>, vector<8x128xf32>,
    return
  }
  func.func @transform_0(%arg0: i32) -> (i32, i32) {
    %c0_i32 = arith.constant 0 : i32
    %c0_i32_0 = arith.constant 0 : i32
    return %arg0, %c0_i32 : i32, i32
  }
  func.func @transform_1(%arg0: i32) -> (i32, i32) {
    %c0_i32 = arith.constant 0 : i32
    %c0_i32_0 = arith.constant 0 : i32
    %c0_i32_1 = arith.constant 0 : i32
    return %c0_i32, %c0_i32_0 : i32, i32
  }
  func.func @transform_2(%arg0: i32) -> (i32, i32) {
    %c0_i32 = arith.constant 0 : i32
    %c0_i32_0 = arith.constant 0 : i32
    %c0_i32_1 = arith.constant 0 : i32
    return %c0_i32, %c0_i32_0 : i32, i32
  }
  func.func @transform_3(%arg0: i32) -> (i32, i32) {
    %c0_i32 = arith.constant 0 : i32
    %c0_i32_0 = arith.constant 0 : i32
    %c0_i32_1 = arith.constant 0 : i32
    return %c0_i32, %c0_i32_0 : i32, i32
  }
  func.func @transform_4(%arg0: i32) -> (i32, i32) {
    %c0_i32 = arith.constant 0 : i32
    %c0_i32_0 = arith.constant 0 : i32
    %c0_i32_1 = arith.constant 0 : i32
    return %c0_i32, %c0_i32_0 : i32, i32
  }
  func.func @transform_5(%arg0: i32) -> (i32, i32) {
    %c0_i32 = arith.constant 0 : i32
    %c0_i32_0 = arith.constant 0 : i32
    return %arg0, %c0_i32 : i32, i32
  }
}

</mosaic_0001>

<bundles_post_ra>
// kernel: grandag_forward.1
= control target key start
LH: loop header
LB: loop body
LE: loop exit
PB: predicated region body
PF: predicated region fallthrough
CT: control target
= control target key end

     0   :  { %10 = vsyncpa [#allocation3], 0  ;;  %s535_s0 = inlined_call_operand.hbm [shape: bf16[8,8], index: 0, kind: input, shape index: {}]   ;;  %s536_s1 = inlined_call_operand.hbm [shape: bf16[8,256], index: 1, kind: input, shape index: {}]   ;;  %s537_s2 = inlined_call_operand.vmem [shape: f32[1,256], index: 2, kind: input, shape index: {}]   ;;  %s538_s3 = inlined_call_operand.hbm [shape: bf16[256,128], index: 3, kind: input, shape index: {}]   ;;  %s539_s4 = inlined_call_operand.vmem [shape: f32[1,128], index: 4, kind: input, shape index: {}]   ;;  %s540_s5 = inlined_call_operand.hbm [shape: f32[8,128], index: 5, kind: output, shape index: {}]  }
   0x1   :  { %11 = vsyncpa [#allocation6], 0 }
   0x2   :  { %12 = vsyncpa [#allocation4], 0  ;;  %s480_s18 = smov [#allocation5]   ;;  %s481_s20 = smov [#allocation2]  }
   0x3   :  { %s29_s19 = sshll.u32 %s480_s18, 4  ;;  %s19_s21 = sshll.u32 %s481_s20, 4  ;;  %s30_s19 = int_to_ptr.vmem [resolvable:$true] %s29_s19  ;;  %s20_s21 = int_to_ptr.vmem [resolvable:$true] %s19_s21 }
   0x4   :  { %s402_s22 = scalar_lea.vmem %s30_s19, 128  ;;  %p407_p1 = scmp.lt.s32.totalorder %s30_s19, %s30_s19 }
   0x5   :  { %p403_p0 = scmp.ne.s32.totalorder %s30_s19, %s402_s22  ;;  %p408_p2 = scmp.lt.s32.totalorder %s402_s22, %s402_s22 }
   0x7   :  { %p409_p3 = por %p408_p2, %p407_p1 }
   0x9   :  { %p410_p4 = pnand %p409_p3, %p403_p0 }
   0xb   :  { %413 = shalt.err (!%p410_p4)
}
   0xc   :  { %32 = dma.hbm_to_vmem [thread:$0]  %s536_s1, 128, %s30_s19, [#allocation6]  }
   0xd   :  { %s422_s25 = scalar_lea.vmem %s20_s21, 64  ;;  %p427_p6 = scmp.lt.s32.totalorder %s20_s21, %s20_s21 }
   0xe   :  { %p423_p5 = scmp.ne.s32.totalorder %s20_s21, %s422_s25  ;;  %p428_p7 = scmp.lt.s32.totalorder %s422_s25, %s422_s25 }
  0x10   :  { %p429_p8 = por %p428_p7, %p427_p6 }
  0x12   :  { %p430_p9 = pnand %p429_p8, %p423_p5 }
  0x14   :  { %433 = shalt.err (!%p430_p9)
}
  0x15   :  { %22 = dma.hbm_to_vmem [thread:$0]  %s535_s0, 64, %s20_s21, [#allocation3]  }
  0x16   :  { %s482_s28 = smov [#allocation7]  }
  0x17   :  { %s40_s29 = sshll.u32 %s482_s28, 4  ;;  %s41_s29 = int_to_ptr.vmem [resolvable:$true] %s40_s29 }
  0x18   :  { %s442_s30 = scalar_lea.vmem %s41_s29, 2048  ;;  %p447_p11 = scmp.lt.s32.totalorder %s41_s29, %s41_s29 }
  0x19   :  { %p443_p10 = scmp.ne.s32.totalorder %s41_s29, %s442_s30  ;;  %p448_p12 = scmp.lt.s32.totalorder %s442_s30, %s442_s30 }
  0x1b   :  { %p449_p13 = por %p448_p12, %p447_p11 }
  0x1d   :  { %p450_p0 = pnand %p449_p13, %p443_p10 }
  0x1f   :  { %453 = shalt.err (!%p450_p0)
}
  0x20   :  { %s483_s1 = smov 64   ;;  %s484_s6 = smov 4  }
  0x21   :  { %46 = dma.hbm_to_vmem [thread:$0]  %s538_s3, 2048, %s41_s29, [#allocation6], %s483_s1, %s483_s1, %s484_s6  }
  0x22   :  { %474 = dma.done.wait [#allocation3], 64  }
  0x23   :  { %475 = vsyncadd [#allocation3], 4294967232 }
  0x24   :  { %476 = dma.done.wait [#allocation6], 2176  }
  0x25   :  { %477 = vsyncadd [#allocation6], 4294965120  ;;  %v485_v0 = vmov 0   ;;  %v60_v1 = vld [vmem:[#allocation5] sm:$0xff]  ;;  %vm82_vm0 = vcmask 1043456   ;;  %v380_v8 = vld [vmem:[#allocation7 + $0x70] sm:$0xff]   ;;  %v63_v22 = vlaneseq }
  0x26   :  { %121 = vmatprep.mubr.bf16.mxu0 %v485_v0  ;;  %v327_v2 = vcombine.high %v60_v1, %v60_v1  ;;  %v326_v3 = vcombine.low %v60_v1, %v60_v1  ;;  %v378_v4 = vld [vmem:[#allocation7 + $0x78] sm:$0xff]   ;;  %v59_v5 = vld [vmem:[#allocation2] sm:$0xf]  ;;  %vm78_vm1 = vcmask 64512   ;;  %v382_v10 = vld [vmem:[#allocation7 + $0x68] sm:$0xff]  }
  0x27   :  { %v379_v6 = vld [vmem:[#allocation7 + $0x38] sm:$0xff]   ;;  %347 = vmatprep.subr.bf16.mxu1 %v378_v4  ;;  %v381_v9 = vld [vmem:[#allocation7 + $0x30] sm:$0xff]   ;;  %v383_v11 = vld [vmem:[#allocation7 + $0x28] sm:$0xff]   ;;  %v64_v23 = vshrl.u32 %v63_v22, 7 }
  0x28   :  { %328 = vmatprep.subr.msk.bf16.mxu0 %vm82_vm0, %v327_v2  ;;  %v84_v7 = vsel %vm82_vm0, %v326_v3, 0  ;;  %348 = vmatpush3.bf16.msra.mxu1 %v379_v6  ;;  %v384_v12 = vld [vmem:[#allocation7 + $0x60] sm:$0xff]   ;;  %v386_v14 = vld [vmem:[#allocation7 + $0x58] sm:$0xff]   ;;  %v388_v16 = vld [vmem:[#allocation7 + $0x50] sm:$0xff]  }
  0x29   :  { %104 = vmatpush1.bf16.msra.mxu0 %v84_v7  ;;  %349 = vmatprep.subr.bf16.mxu1 %v380_v8  ;;  %v385_v13 = vld [vmem:[#allocation7 + $0x20] sm:$0xff]   ;;  %v387_v15 = vld [vmem:[#allocation7 + $0x18] sm:$0xff]   ;;  %v389_v17 = vld [vmem:[#allocation7 + $0x10] sm:$0xff]   ;;  %v65_v24 = vsub.s32 0, %v64_v23  ;;  %v69_v26 = vsub.s32 1, %v64_v23 }
  0x2a   :  { %v390_v18 = vld [vmem:[#allocation7 + $0x48] sm:$0xff]   ;;  %v392_v20 = vld [vmem:[#allocation7 + $0x40] sm:$0xff]   ;;  %v61_v25 = vld [vmem:[%s537_s2] sm:$0x3]  ;;  %s486_s2 = smov [#allocation8]  }
  0x2b   :  { %v391_v19 = vld [vmem:[#allocation7 + $0x8] sm:$0xff]   ;;  %v393_v21 = vld [vmem:[#allocation7] sm:$0xff]   ;;  %v66_v27 = vrot.slane %v61_v25, %v65_v24  ;;  %v70_v28 = vrot.slane %v61_v25, %v69_v26  ;;  %v330_v40 = vld [vmem:[%s539_s4] ss:$0 sm:$0xff]  ;;  %s316_s11 = sshll.u32 %s486_s2, 4  ;;  %s317_s11 = int_to_ptr.vmem [resolvable:$true] %s316_s11 }
  0x2c   :  { %329 = vmatmul.mubr.msk.bf16.vlgmr.msra.gmra.mxu0 %vm78_vm1, %v59_v5  ;;  %350 = vmatpush3.bf16.msra.mxu1 %v381_v9  ;;  %s454_s12 = scalar_lea.vmem %s317_s11, 128  ;;  %p459_p2 = scmp.lt.s32.totalorder %s317_s11, %s317_s11 }
  0x2d   :  { %351 = vmatprep.subr.bf16.mxu1 %v382_v10  ;;  %p455_p1 = scmp.ne.s32.totalorder %s317_s11, %s454_s12  ;;  %p460_p3 = scmp.lt.s32.totalorder %s454_s12, %s454_s12 }
  0x2f   :  { %p461_p4 = por %p460_p3, %p459_p2 }
  0x30   :  { %352 = vmatpush3.bf16.msra.mxu1 %v383_v11 }
  0x31   :  { %353 = vmatprep.subr.bf16.mxu1 %v384_v12  ;;  %p462_p5 = pnand %p461_p4, %p455_p1 }
  0x34   :  { %354 = vmatpush3.bf16.msra.mxu1 %v385_v13 }
  0x35   :  { %355 = vmatprep.subr.bf16.mxu1 %v386_v14 }
  0x38   :  { %356 = vmatpush3.bf16.msra.mxu1 %v387_v15 }
  0x39   :  { %357 = vmatprep.subr.bf16.mxu1 %v388_v16 }
  0x3c   :  { %358 = vmatpush3.bf16.msra.mxu1 %v389_v17 }
  0x3d   :  { %359 = vmatprep.subr.bf16.mxu1 %v390_v18 }
  0x40   :  { %360 = vmatpush3.bf16.msra.mxu1 %v391_v19 }
  0x41   :  { %361 = vmatprep.subr.bf16.mxu1 %v392_v20 }
  0x44   :  { %362 = vmatpush3.bf16.msra.mxu1 %v393_v21 }
  0xec   :  { %v123_v29 = vpop.f32.mrf.mxu0 }
  0xed   :  { %v124_v30 = vadd.f32 %v123_v29, %v66_v27 }
  0xee   :  { %v125_v31 = vpop.f32.mrf.mxu0 }
  0xef   :  { %v126_v32 = vadd.f32 %v125_v31, %v70_v28  ;;  %v130_v33 = vmax.f32 %v124_v30, 0.0 }
  0xf0   :  { %v127_v34 = vpop.f32.mrf.mxu0 }
  0xf1   :  { %v131_v35 = vmax.f32 %v126_v32, 0.0  ;;  %v132_v38 = vpack.c.bf16 %v130_v33, %v130_v33 }
  0xf2   :  { %v128_v36 = vpop.f32.mrf.mxu0 }
  0xf3   :  { %v133_v37 = vpack.c.bf16 %v131_v35, %v131_v35 }
  0xf5   :  { %301 = vmatprep.mubr.bf16.mxu1 %v133_v37 }
  0xf6   :  { %302 = vmatmul.mubr.bf16.vlgmr.msra.gmra.mxu1 %v132_v38 }
 0x1b6   :  { %v363_v39 = vpop.f32.mrf.mxu1 }
 0x1b8   :  { %v364_v41 = vpop.f32.mrf.mxu1 }
 0x1b9   :  { %v365_v42 = vadd.f32 %v364_v41, %v363_v39 }
 0x1ba   :  { %v366_v43 = vpop.f32.mrf.mxu1 }
 0x1bb   :  { %v304_v44 = vadd.f32 %v365_v42, %v330_v40 }
 0x1bc   :  { %v367_v45 = vpop.f32.mrf.mxu1 }
 0x1bd   :  { %309 = vst [vmem:[#allocation8] sm:$0xff] %v304_v44 }
 0x1be   :  { %465 = shalt.err (!%p462_p5)
}
 0x1bf   :  { %319 = dma.vmem_to_hbm [thread:$0]  %s317_s11, 128, %s540_s5, [#allocation4]  }
 0x1c0   :  { %478 = dma.done.wait [#allocation4], 128  }
 0x1c1   :  { %479 = vsyncadd [#allocation4], 4294967168 }
 0x1c2   :  { %323 = vsyncpa [#allocation3], 1 }
 0x1c3   :  { %324 = vsyncpa [#allocation6], 1 }
 0x1c4   :  { %325 = vsyncpa [#allocation4], 1 }

</bundles_post_ra>
